<compile_context>
chip_gen: v7x
topology: tpu7x:2x2x1
jax: 0.10.0
libtpu: 0.0.40
codegen_flags: <defaults>
</compile_context>

<pallas_src>
import functools

import jax
import jax.numpy as jnp
from jax.experimental import pallas as pl
from jax.experimental.pallas import tpu as pltpu


def _round_up(a: int, b: int) -> int:
    return (a + b - 1) // b * b


def _vq_kernel(x_ref, en2t_ref, e2_ref, e_ref,
               q_ref, idx_ref, cnt_ref, sse_ref, *,
               n_valid, t_inner, padded):
    """One grid step processes a [TN, D] tile of the flattened input.

    x_ref    : [TN, D]    input tile
    en2t_ref : [D,  K]    resident (-2 * E)^T, pre-folded in the wrapper
    e2_ref   : [1,  K]    resident ||e_k||^2
    e_ref    : [K,  D]    resident codebook (f32), for the one-hot matmul
    q_ref    : [TN, D]    quantized output tile
    idx_ref  : [1, TN]    argmin code index per row (int32, lane-dense)
    cnt_ref  : [1, 1, K]  per-code counts (accumulated over the inner axis)
    sse_ref  : [1, 1, D]  squared-error partial sums (lane-wide accumulator)
    """
    i = pl.program_id(0)   # outer, "parallel"  (megacore split of N)
    j = pl.program_id(1)   # inner, "arbitrary" (accumulator axis)

    x = x_ref[...]
    if x.dtype != jnp.float32:
        x = x.astype(jnp.float32)                           # only if sub-32-bit
    tn = x.shape[0]
    k = e_ref.shape[0]

    # argmin_k ||x - e_k||^2 == argmin_k (||e_k||^2 - 2 x.e_k): the per-row
    # ||x||^2 term cannot change the argmin, so it is dropped.  The -2 factor
    # and the transpose are folded into en2t in the wrapper.
    dist = e2_ref[...] + jnp.dot(x, en2t_ref[...],
                                 preferred_element_type=jnp.float32)   # [TN,K]

    # first index on ties, like torch.argmin
    idx = jnp.argmin(dist, axis=1).astype(jnp.int32)        # [TN]
    idx_ref[...] = idx[None, :]                              # lane-dense store

    # one-hot rows; padded tail rows (if any) get an all-zero row so they do
    # not contribute to counts, quantized output or the squared error.
    idx_col = idx[:, None]                                   # [TN, 1]
    if padded:
        row = jax.lax.broadcasted_iota(jnp.int32, (tn, 1), 0)
        base = (i * t_inner + j) * tn
        valid = (row + base) < n_valid
        sel = jnp.where(valid, idx_col, k)       # k is out of [0, K) -> no hit
    else:
        sel = idx_col
    lane = jax.lax.broadcasted_iota(jnp.int32, (tn, k), 1)
    onehot = (sel == lane).astype(jnp.float32)               # [TN, K]

    # quantized = encodings @ embedding (MXU); rows are exact codebook entries
    q = jnp.dot(onehot, e_ref[...], preferred_element_type=jnp.float32)  # [TN,D]
    q_ref[...] = q.astype(q_ref.dtype)

    # per-core accumulators, re-initialized at the start of every outer block
    @pl.when(j == 0)
    def _():
        cnt_ref[...] = jnp.zeros_like(cnt_ref)
        sse_ref[...] = jnp.zeros_like(sse_ref)

    cnt_ref[...] += jnp.sum(onehot, axis=0, keepdims=True)[None]        # [1,1,K]
    diff = q - x                       # padded rows: q == 0 and x == 0 -> 0
    sse_ref[...] += jnp.sum(diff * diff, axis=0, keepdims=True)[None]   # [1,1,D]


@functools.partial(jax.jit, static_argnames=("commitment_cost", "tile_n"))
def vector_quantizer(inputs, embedding, commitment_cost=0.25, tile_n=1024):
    """Forward pass of VectorQuantizer.

    inputs    : [..., D]   (channels last, D == embedding_dim)
    embedding : [K, D]     codebook weights

    Returns (loss, quantized, perplexity, encoding_indices_show) with the same
    forward-pass semantics as the PyTorch module (detach / straight-through
    only affect gradients, so the forward values coincide).
    """
    input_shape = inputs.shape
    k, d = embedding.shape
    flat = inputs.reshape(-1, d)
    n = flat.shape[0]

    # --- tiling over N ------------------------------------------------------
    # Tile kept 128-aligned so the lane-dense index row and the sublane dim of
    # the input tile are always aligned.
    tn = min(tile_n, _round_up(n, 128))
    t_total = pl.cdiv(n, tn)
    if t_total >= 2:
        # Guarantee a 2-way "parallel" split (v7x megacore); pad an extra tile
        # when the tile count is odd rather than silently serializing.
        t_total = _round_up(t_total, 2)
        ns = 2
    else:
        ns = 1
    t_inner = t_total // ns
    n_pad = t_total * tn
    padded = n_pad != n
    if padded:
        flat = jnp.pad(flat, ((0, n_pad - n), (0, 0)))

    # Hoisted once (resident in VMEM every step): f32 codebook, squared norms,
    # and the pre-folded (-2 E)^T distance operand.
    emb_f32 = embedding.astype(jnp.float32)                            # [K, D]
    e2 = jnp.sum(emb_f32 ** 2, axis=1)[None, :]                        # [1, K]
    en2t = (-2.0 * emb_f32).T                                          # [D, K]

    kernel = functools.partial(_vq_kernel, n_valid=n, t_inner=t_inner,
                               padded=padded)

    q_flat, idx_rows, counts, sse_part = pl.pallas_call(
        kernel,
        out_shape=(
            jax.ShapeDtypeStruct((n_pad, d), inputs.dtype),   # quantized (flat)
            jax.ShapeDtypeStruct((t_total, tn), jnp.int32),   # indices, lane-dense
            jax.ShapeDtypeStruct((ns, 1, k), jnp.float32),    # counts per core
            jax.ShapeDtypeStruct((ns, 1, d), jnp.float32),    # SSE partials
        ),
        grid_spec=pltpu.PrefetchScalarGridSpec(
            num_scalar_prefetch=0,
            grid=(ns, t_inner),
            in_specs=[
                pl.BlockSpec((tn, d), lambda i, j: (i * t_inner + j, 0)),
                pl.BlockSpec((d, k), lambda i, j: (0, 0)),     # (-2 E)^T
                pl.BlockSpec((1, k), lambda i, j: (0, 0)),     # ||e||^2
                pl.BlockSpec((k, d), lambda i, j: (0, 0)),     # codebook
            ],
            out_specs=[
                pl.BlockSpec((tn, d), lambda i, j: (i * t_inner + j, 0)),
                pl.BlockSpec((1, tn), lambda i, j: (i * t_inner + j, 0)),
                pl.BlockSpec((1, 1, k), lambda i, j: (i, 0, 0)),
                pl.BlockSpec((1, 1, d), lambda i, j: (i, 0, 0)),
            ],
        ),
        compiler_params=pltpu.CompilerParams(
            dimension_semantics=("parallel", "arbitrary"),
        ),
    )(flat, en2t, e2, emb_f32)

    quantized = q_flat[:n].reshape(input_shape)

    sse = jnp.sum(sse_part)
    mse = sse / jnp.float32(n * d)
    # forward value: q_latent_loss == e_latent_loss == mse
    loss = mse + commitment_cost * mse
    # TODO(synk): add a custom_vjp for the straight-through estimator / detach
    # semantics if gradients through this op are needed (forward-only here).

    avg_probs = jnp.sum(counts, axis=(0, 1)) / jnp.float32(n)
    perplexity = jnp.exp(-jnp.sum(avg_probs * jnp.log(avg_probs + 1e-10)))

    encoding_indices_show = idx_rows.reshape(-1)[:n].reshape(1, -1)
    return loss, quantized, perplexity, encoding_indices_show


if __name__ == "__main__":
    num_embeddings = 128     # K
    embedding_dim = 32       # D
    commitment_cost = 0.25

    key = jax.random.PRNGKey(0)
    k_emb, k_in = jax.random.split(key)

    # deterministic init: uniform(-1/K, 1/K), matching the module's __init__
    embedding = jax.random.uniform(
        k_emb, (num_embeddings, embedding_dim), dtype=jnp.float32,
        minval=-1.0 / num_embeddings, maxval=1.0 / num_embeddings)

    # inputs: [B, H, W, D] with D == embedding_dim (channels last)
    x = jax.random.normal(k_in, (2, 8, 8, embedding_dim), dtype=jnp.float32)

    loss, quantized, perplexity, idx_show = vector_quantizer(
        x, embedding, commitment_cost=commitment_cost)
    jax.block_until_ready((loss, quantized, perplexity, idx_show))

    # pure-JAX reference of the forward pass
    flat = x.reshape(-1, embedding_dim)
    ref_dist = (jnp.sum(flat ** 2, axis=1, keepdims=True)
                + jnp.sum(embedding ** 2, axis=1)
                - 2.0 * flat @ embedding.T)
    ref_idx = jnp.argmin(ref_dist, axis=1)
    ref_q = embedding[ref_idx].reshape(x.shape)
    ref_mse = jnp.mean((ref_q - x) ** 2)
    ref_loss = ref_mse + commitment_cost * ref_mse

    assert quantized.shape == x.shape
    assert idx_show.shape == (1, 2 * 8 * 8)
    # quantized rows must be exact codebook entries selected by the indices
    assert jnp.allclose(quantized.reshape(-1, embedding_dim),
                        embedding[idx_show.reshape(-1)], atol=1e-6)
    # loss matches the reference (tolerant to float near-ties in the argmin)
    assert jnp.allclose(loss, ref_loss, rtol=1e-4, atol=1e-6)
    assert bool(jnp.isfinite(perplexity))

    print("KERNEL_OK")
</pallas_src>

<mosaic_0001>
module attributes {stable_mosaic.version = 11 : i64} {
  func.func @_vq_kernel(%arg0: i32, %arg1: i32, %arg2: memref<128x32xf32, #tpu.memory_space<vmem>>, %arg3: memref<32x128xf32, #tpu.memory_space<vmem>>, %arg4: memref<1x128xf32, #tpu.memory_space<vmem>>, %arg5: memref<128x32xf32, #tpu.memory_space<vmem>>, %arg6: memref<128x32xf32, #tpu.memory_space<vmem>>, %arg7: memref<1x128xi32, #tpu.memory_space<vmem>>, %arg8: memref<1x1x128xf32, #tpu.memory_space<vmem>>, %arg9: memref<1x1x32xf32, #tpu.memory_space<vmem>>) attributes {dimension_semantics = [#tpu.dimension_semantics<parallel>, #tpu.dimension_semantics<arbitrary>], iteration_bounds = array<i64: 1, 1>, scalar_prefetch = 0 : i64, scratch_operands = 0 : i64, tpu.core_type = #tpu.core_type<tc>, window_params = [{transform_indices = @transform_0, window_bounds = array<i64: 128, 32>}, {pipeline_mode = #tpu.pipeline_mode<synchronous>, transform_indices = @transform_1, window_bounds = array<i64: 32, 128>}, {pipeline_mode = #tpu.pipeline_mode<synchronous>, transform_indices = @transform_2, window_bounds = array<i64: 1, 128>}, {pipeline_mode = #tpu.pipeline_mode<synchronous>, transform_indices = @transform_3, window_bounds = array<i64: 128, 32>}, {transform_indices = @transform_4, window_bounds = array<i64: 128, 32>}, {transform_indices = @transform_5, window_bounds = array<i64: 1, 128>}, {transform_indices = @transform_6, window_bounds = array<i64: 1, 1, 128>}, {transform_indices = @transform_7, window_bounds = array<i64: 1, 1, 32>}]} {
    %c0 = arith.constant 0 : index
    %c0_0 = arith.constant 0 : index
    %0 = vector.load %arg2[%c0, %c0_0] : memref<128x32xf32, #tpu.memory_space<vmem>>, vector<128x32xf32>
    %c0_1 = arith.constant 0 : index
    %c0_2 = arith.constant 0 : index
    %1 = vector.load %arg4[%c0_1, %c0_2] : memref<1x128xf32, #tpu.memory_space<vmem>>, vector<1x128xf32>
    %c0_3 = arith.constant 0 : index
    %c0_4 = arith.constant 0 : index
    %2 = vector.load %arg3[%c0_3, %c0_4] : memref<32x128xf32, #tpu.memory_space<vmem>>, vector<32x128xf32>
    %cst = arith.constant dense<0.000000e+00> : vector<128x128xf32>
    %3 = tpu.matmul %0, %2, %cst {dimension_numbers = #tpu.dot_dimension_numbers<[1], [0], [0], [1], [0, 0, 1, 1], [], []>} : vector<128x32xf32>, vector<32x128xf32>, vector<128x128xf32> -> vector<128x128xf32>
    %4 = vector.broadcast %1 : vector<1x128xf32> to vector<128x128xf32>
    %5 = arith.addf %4, %3 : vector<128x128xf32>
    %6 = tpu.reduce_index %5 {axis = 1 : i32, kind = #tpu.reduction_kind<arg_min>} : vector<128x128xf32> -> vector<128xi32>
    %7 = vector.shape_cast %6 : vector<128xi32> to vector<1x128xi32>
    %c0_5 = arith.constant 0 : index
    %c0_6 = arith.constant 0 : index
    %8 = vector.load %arg7[%c0_5, %c0_6] : memref<1x128xi32, #tpu.memory_space<vmem>>, vector<1x128xi32>
    tpu.vector_store %arg7[%c0_5, %c0_6], %7 {strides = array<i32>} : memref<1x128xi32, #tpu.memory_space<vmem>>, vector<1x128xi32>,
    %9 = vector.shape_cast %6 : vector<128xi32> to vector<128x1xi32>
    %10 = tpu.iota {dimensions = array<i32: 1>} : vector<128x128xi32>
    %11 = vector.broadcast %9 : vector<128x1xi32> to vector<128x128xi32>
    %12 = arith.cmpi eq, %11, %10 : vector<128x128xi32>
    %13 = arith.extui %12 : vector<128x128xi1> to vector<128x128xi32>
    %14 = arith.sitofp %13 : vector<128x128xi32> to vector<128x128xf32>
    %c0_7 = arith.constant 0 : index
    %c0_8 = arith.constant 0 : index
    %15 = vector.load %arg5[%c0_7, %c0_8] : memref<128x32xf32, #tpu.memory_space<vmem>>, vector<128x32xf32>
    %cst_9 = arith.constant dense<0.000000e+00> : vector<128x32xf32>
    %16 = tpu.matmul %14, %15, %cst_9 {dimension_numbers = #tpu.dot_dimension_numbers<[1], [0], [0], [1], [0, 0, 1, 1], [], []>} : vector<128x128xf32>, vector<128x32xf32>, vector<128x32xf32> -> vector<128x32xf32>
    %c0_10 = arith.constant 0 : index
    %c0_11 = arith.constant 0 : index
    %17 = vector.load %arg6[%c0_10, %c0_11] : memref<128x32xf32, #tpu.memory_space<vmem>>, vector<128x32xf32>
    tpu.vector_store %arg6[%c0_10, %c0_11], %16 {strides = array<i32>} : memref<128x32xf32, #tpu.memory_space<vmem>>, vector<128x32xf32>,
    %c0_i32 = arith.constant 0 : i32
    %18 = arith.cmpi eq, %arg1, %c0_i32 : i32
    %19 = arith.extui %18 : i1 to i32
    %c0_i32_12 = arith.constant 0 : i32
    %20 = arith.cmpi ne, %19, %c0_i32_12 : i32
    scf.if %20 {
      %cst_27 = arith.constant 0.000000e+00 : f32
      %35 = vector.broadcast %cst_27 : f32 to vector<1x1x128xf32>
      %c0_28 = arith.constant 0 : index
      %c0_29 = arith.constant 0 : index
      %c0_30 = arith.constant 0 : index
      %36 = vector.load %arg8[%c0_28, %c0_29, %c0_30] : memref<1x1x128xf32, #tpu.memory_space<vmem>>, vector<1x1x128xf32>
      tpu.vector_store %arg8[%c0_28, %c0_29, %c0_30], %35 {strides = array<i32>} : memref<1x1x128xf32, #tpu.memory_space<vmem>>, vector<1x1x128xf32>,
      %cst_31 = arith.constant 0.000000e+00 : f32
      %37 = vector.broadcast %cst_31 : f32 to vector<1x1x32xf32>
      %c0_32 = arith.constant 0 : index
      %c0_33 = arith.constant 0 : index
      %c0_34 = arith.constant 0 : index
      %38 = vector.load %arg9[%c0_32, %c0_33, %c0_34] : memref<1x1x32xf32, #tpu.memory_space<vmem>>, vector<1x1x32xf32>
      tpu.vector_store %arg9[%c0_32, %c0_33, %c0_34], %37 {strides = array<i32>} : memref<1x1x32xf32, #tpu.memory_space<vmem>>, vector<1x1x32xf32>,
    } else {
    }
    %c0_13 = arith.constant 0 : index
    %c0_14 = arith.constant 0 : index
    %c0_15 = arith.constant 0 : index
    %21 = vector.load %arg8[%c0_13, %c0_14, %c0_15] : memref<1x1x128xf32, #tpu.memory_space<vmem>>, vector<1x1x128xf32>
    %cst_16 = arith.constant dense<0.000000e+00> : vector<128xf32>
    %22 = vector.multi_reduction <add>, %14, %cst_16 [0] : vector<128x128xf32> to vector<128xf32>
    %23 = vector.shape_cast %22 : vector<128xf32> to vector<1x128xf32>
    %24 = vector.shape_cast %23 : vector<1x128xf32> to vector<1x1x128xf32>
    %25 = arith.addf %21, %24 : vector<1x1x128xf32>
    %c0_17 = arith.constant 0 : index
    %c0_18 = arith.constant 0 : index
    %c0_19 = arith.constant 0 : index
    %26 = vector.load %arg8[%c0_17, %c0_18, %c0_19] : memref<1x1x128xf32, #tpu.memory_space<vmem>>, vector<1x1x128xf32>
    tpu.vector_store %arg8[%c0_17, %c0_18, %c0_19], %25 {strides = array<i32>} : memref<1x1x128xf32, #tpu.memory_space<vmem>>, vector<1x1x128xf32>,
    %27 = arith.subf %16, %0 : vector<128x32xf32>
    %c0_20 = arith.constant 0 : index
    %c0_21 = arith.constant 0 : index
    %c0_22 = arith.constant 0 : index
    %28 = vector.load %arg9[%c0_20, %c0_21, %c0_22] : memref<1x1x32xf32, #tpu.memory_space<vmem>>, vector<1x1x32xf32>
    %29 = arith.mulf %27, %27 : vector<128x32xf32>
    %cst_23 = arith.constant dense<0.000000e+00> : vector<32xf32>
    %30 = vector.multi_reduction <add>, %29, %cst_23 [0] : vector<128x32xf32> to vector<32xf32>
    %31 = vector.shape_cast %30 : vector<32xf32> to vector<1x32xf32>
    %32 = vector.shape_cast %31 : vector<1x32xf32> to vector<1x1x32xf32>
    %33 = arith.addf %28, %32 : vector<1x1x32xf32>
    %c0_24 = arith.constant 0 : index
    %c0_25 = arith.constant 0 : index
    %c0_26 = arith.constant 0 : index
    %34 = vector.load %arg9[%c0_24, %c0_25, %c0_26] : memref<1x1x32xf32, #tpu.memory_space<vmem>>, vector<1x1x32xf32>
    tpu.vector_store %arg9[%c0_24, %c0_25, %c0_26], %33 {strides = array<i32>} : memref<1x1x32xf32, #tpu.memory_space<vmem>>, vector<1x1x32xf32>,
    return
  }
  func.func @transform_0(%arg0: i32, %arg1: i32) -> (i32, i32) {
    %c1_i32 = arith.constant 1 : i32
    %0 = arith.muli %arg0, %c1_i32 : i32
    %1 = arith.addi %0, %arg1 : i32
    %c0_i32 = arith.constant 0 : i32
    %c0_i32_0 = arith.constant 0 : i32
    return %1, %c0_i32 : i32, i32
  }
  func.func @transform_1(%arg0: i32, %arg1: i32) -> (i32, i32) {
    %c0_i32 = arith.constant 0 : i32
    %c0_i32_0 = arith.constant 0 : i32
    %c0_i32_1 = arith.constant 0 : i32
    return %c0_i32, %c0_i32_0 : i32, i32
  }
  func.func @transform_2(%arg0: i32, %arg1: i32) -> (i32, i32) {
    %c0_i32 = arith.constant 0 : i32
    %c0_i32_0 = arith.constant 0 : i32
    %c0_i32_1 = arith.constant 0 : i32
    return %c0_i32, %c0_i32_0 : i32, i32
  }
  func.func @transform_3(%arg0: i32, %arg1: i32) -> (i32, i32) {
    %c0_i32 = arith.constant 0 : i32
    %c0_i32_0 = arith.constant 0 : i32
    %c0_i32_1 = arith.constant 0 : i32
    return %c0_i32, %c0_i32_0 : i32, i32
  }
  func.func @transform_4(%arg0: i32, %arg1: i32) -> (i32, i32) {
    %c1_i32 = arith.constant 1 : i32
    %0 = arith.muli %arg0, %c1_i32 : i32
    %1 = arith.addi %0, %arg1 : i32
    %c0_i32 = arith.constant 0 : i32
    %c0_i32_0 = arith.constant 0 : i32
    return %1, %c0_i32 : i32, i32
  }
  func.func @transform_5(%arg0: i32, %arg1: i32) -> (i32, i32) {
    %c1_i32 = arith.constant 1 : i32
    %0 = arith.muli %arg0, %c1_i32 : i32
    %1 = arith.addi %0, %arg1 : i32
    %c0_i32 = arith.constant 0 : i32
    %c0_i32_0 = arith.constant 0 : i32
    return %1, %c0_i32 : i32, i32
  }
  func.func @transform_6(%arg0: i32, %arg1: i32) -> (i32, i32, i32) {
    %c0_i32 = arith.constant 0 : i32
    %c0_i32_0 = arith.constant 0 : i32
    %c0_i32_1 = arith.constant 0 : i32
    return %arg0, %c0_i32, %c0_i32_0 : i32, i32, i32
  }
  func.func @transform_7(%arg0: i32, %arg1: i32) -> (i32, i32, i32) {
    %c0_i32 = arith.constant 0 : i32
    %c0_i32_0 = arith.constant 0 : i32
    %c0_i32_1 = arith.constant 0 : i32
    return %arg0, %c0_i32, %c0_i32_0 : i32, i32, i32
  }
}

</mosaic_0001>

<bundles_post_ra>
// kernel: vector_quantizer.1
= control target key start
LH: loop header
LB: loop body
LE: loop exit
PB: predicated region body
PF: predicated region fallthrough
CT: control target
= control target key end

     0   :  { %13 = vsyncpa [#allocation3], 0  ;;  %vm69_vm0 = vcmask 261120   ;;  %s1519_s0 = inlined_call_operand.vmem [shape: f32[128,32], index: 0, kind: input, shape index: {}]   ;;  %s1520_s1 = inlined_call_operand.vmem [shape: f32[32,128], index: 1, kind: input, shape index: {}]   ;;  %s1521_s2 = inlined_call_operand.vmem [shape: f32[1,128], index: 2, kind: input, shape index: {}]   ;;  %s1522_s3 = inlined_call_operand.vmem [shape: f32[128,32], index: 3, kind: input, shape index: {}]   ;;  %s1523_s4 = inlined_call_operand.hbm [shape: f32[128,32], index: 4, kind: output, shape index: {0}]   ;;  %s1524_s5 = inlined_call_operand.hbm [shape: s32[1,128], index: 5, kind: output, shape index: {1}]   ;;  %s1525_s6 = inlined_call_operand.vmem [shape: f32[1,1,128], index: 6, kind: output, shape index: {2}]   ;;  %s1526_s7 = inlined_call_operand.vmem [shape: f32[1,1,32], index: 7, kind: output, shape index: {3}]  }
   0x1   :  { %v65_v0 = vld [vmem:[%s1520_s1] sm:$0xff]  ;;  %v66_v1 = vld [vmem:[%s1520_s1 + $0x8] sm:$0xff]  ;;  %v67_v2 = vld [vmem:[%s1520_s1 + $0x10] sm:$0xff] }
   0x2   :  { %v998_v3 = vpack.c.bf16 %v66_v1, %v65_v0  ;;  %v68_v4 = vld [vmem:[%s1520_s1 + $0x18] sm:$0xff]  ;;  %v1169_v5 = vld [vmem:[%s1519_s0] sm:$0xff] }
   0x3   :  { %v1002_v6 = vpack.c.bf16 %v68_v4, %v67_v2  ;;  %918 = vmatprep.mubr.msk.f32.mxu0 %vm69_vm0, %v1169_v5 }
   0x4   :  { %999 = vmatprep.subr.bf16.mxu0 %v998_v3 }
   0x5   :  { %1001 = vmatpush3.bf16.msra.mxu0 %v998_v3 }
   0x6   :  { %1003 = vmatprep.subr.bf16.mxu0 %v1002_v6 }
   0x7   :  { %14 = vsyncpa [#allocation5], 0  ;;  %v1176_v7 = vld [vmem:[%s1519_s0 + $0x8] sm:$0xff]  ;;  %v1181_v8 = vld [vmem:[%s1519_s0 + $0x10] sm:$0xff]  ;;  %v1108_v27 = vmov 0.0   ;;  %vm328_vm2 = vcmask 130112  }
   0x8   :  { %v1190_v9 = vld [vmem:[%s1519_s0 + $0x18] sm:$0xff]  ;;  %v1195_v10 = vld [vmem:[%s1519_s0 + $0x20] sm:$0xff]  ;;  %v1204_v11 = vld [vmem:[%s1519_s0 + $0x28] sm:$0xff]  ;;  %658 = vst [vmem:[%s1525_s6] sm:$0x1] %v1108_v27  ;;  %vm335_vm5 = vcmask 195712   ;;  %vm342_vm6 = vcmask 261312  }
   0x9   :  { %1005 = vmatpush3.bf16.msra.mxu0 %v1002_v6  ;;  %v1209_v12 = vld [vmem:[%s1519_s0 + $0x30] sm:$0xff]  ;;  %v1218_v13 = vld [vmem:[%s1519_s0 + $0x38] sm:$0xff]  ;;  %v1223_v14 = vld [vmem:[%s1519_s0 + $0x40] sm:$0xff]  ;;  %vm349_vm9 = vcmask 326912   ;;  %vm356_vm10 = vcmask 392512   ;;  %vm363_vm13 = vcmask 458112  }
   0xa   :  { %v1232_v15 = vld [vmem:[%s1519_s0 + $0x48] sm:$0xff]  ;;  %v1237_v16 = vld [vmem:[%s1519_s0 + $0x50] sm:$0xff]  ;;  %v1246_v17 = vld [vmem:[%s1519_s0 + $0x58] sm:$0xff]  ;;  %vm370_vm14 = vcmask 523712   ;;  %s1110_s30 = smov [#allocation4]  }
   0xb   :  { %v1251_v18 = vld [vmem:[%s1519_s0 + $0x60] sm:$0xff]  ;;  %v1260_v19 = vld [vmem:[%s1519_s0 + $0x68] sm:$0xff]  ;;  %v1265_v20 = vld [vmem:[%s1519_s0 + $0x70] sm:$0xff]  ;;  %s783_s8 = sshll.u32 %s1110_s30, 4  ;;  %s784_s8 = int_to_ptr.vmem [resolvable:$true] %s783_s8 }
   0xc   :  { %919 = vmatmul.mubr.msk.f32.vlgmr.msra.gmra.mrb[0].mxu0 %vm69_vm0, %v1176_v7  ;;  %v1274_v21 = vld [vmem:[%s1519_s0 + $0x78] sm:$0xff]  ;;  %v477_v22 = vld [vmem:[%s1522_s3] sm:$0xff]  ;;  %v478_v23 = vld [vmem:[%s1522_s3 + $0x8] sm:$0xff]  ;;  %s1060_s9 = scalar_lea.vmem %s784_s8, 16  ;;  %s1064_s10 = scalar_lea.vmem %s784_s8, 32 }
   0xd   :  { %921 = vmatprep.mubr.msk.f32.mxu0 %vm69_vm0, %v1181_v8  ;;  %v479_v24 = vld [vmem:[%s1522_s3 + $0x10] sm:$0xff]  ;;  %v1006_v25 = vpack.c.bf16 %v478_v23, %v477_v22  ;;  %v480_v26 = vld [vmem:[%s1522_s3 + $0x18] sm:$0xff]  ;;  %v481_v29 = vld [vmem:[%s1522_s3 + $0x20] sm:$0xff]  ;;  %p1061_p0 = scmp.ne.s32.totalorder %s784_s8, %s1060_s9  ;;  %p1065_p1 = scmp.lt.s32.totalorder %s784_s8, %s784_s8 }
   0xe   :  { %v1010_v28 = vpack.c.bf16 %v480_v26, %v479_v24  ;;  %v482_v30 = vld [vmem:[%s1522_s3 + $0x28] sm:$0xff]  ;;  %v483_v32 = vld [vmem:[%s1522_s3 + $0x30] sm:$0xff]  ;;  %v484_v33 = vld [vmem:[%s1522_s3 + $0x38] sm:$0xff]  ;;  %p1066_p2 = scmp.lt.s32.totalorder %s1064_s10, %s1060_s9 }
   0xf   :  { %1007 = vmatprep.subr.bf16.mxu0 %v1006_v25  ;;  %1038 = vmatprep.subr.bf16.mxu1 %v1006_v25  ;;  %v1014_v31 = vpack.c.bf16 %v482_v30, %v481_v29  ;;  %v1018_v34 = vpack.c.bf16 %v484_v33, %v483_v32  ;;  %v485_v35 = vld [vmem:[%s1522_s3 + $0x40] sm:$0xff]  ;;  %v486_v36 = vld [vmem:[%s1522_s3 + $0x48] sm:$0xff]  ;;  %v487_v38 = vld [vmem:[%s1522_s3 + $0x50] sm:$0xff]  ;;  %v317_v33 = vlaneseq }
  0x10   :  { %922 = vmatmul.mubr.msk.f32.gmra.mrb[2].mxu0 %vm69_vm0, %v1190_v9  ;;  %1046 = vmatpush3.bf16.msra.mxu1 %v1006_v25  ;;  %v1022_v37 = vpack.c.bf16 %v486_v36, %v485_v35  ;;  %v488_v39 = vld [vmem:[%s1522_s3 + $0x58] sm:$0xff]  ;;  %v489_v41 = vld [vmem:[%s1522_s3 + $0x60] sm:$0xff]  ;;  %v490_v42 = vld [vmem:[%s1522_s3 + $0x68] sm:$0xff]  ;;  %p1067_p3 = por %p1066_p2, %p1065_p1 }
  0x11   :  { %924 = vmatprep.mubr.msk.f32.mxu0 %vm69_vm0, %v1195_v10  ;;  %1009 = vmatpush3.bf16.msra.mxu0 %v1006_v25  ;;  %v1026_v40 = vpack.c.bf16 %v488_v39, %v487_v38  ;;  %v1030_v43 = vpack.c.bf16 %v490_v42, %v489_v41  ;;  %v825_v44 = vld [vmem:[%s1521_s2] ss:$0 sm:$0xff]  ;;  %v491_v61 = vld [vmem:[%s1522_s3 + $0x70] sm:$0xff]  ;;  %v492_v62 = vld [vmem:[%s1522_s3 + $0x78] sm:$0xff]  ;;  %v1335_v35 = vshrl.u32 %v317_v33, 7  ;;  %v1109_v42 = vmov 1.0  }
  0x12   :  { %1011 = vmatprep.subr.bf16.mxu0 %v1010_v28  ;;  %1039 = vmatprep.subr.bf16.mxu1 %v1010_v28  ;;  %v1034_v0 = vpack.c.bf16 %v492_v62, %v491_v61  ;;  %p1068_p4 = pnand %p1067_p3, %p1061_p0 }
  0x14   :  { %925 = vmatmul.mubr.msk.f32.gmra.mrb[4].mxu0 %vm69_vm0, %v1204_v11  ;;  %1047 = vmatpush3.bf16.msra.mxu1 %v1010_v28 }
  0x15   :  { %927 = vmatprep.mubr.msk.f32.mxu0 %vm69_vm0, %v1209_v12  ;;  %1013 = vmatpush3.bf16.msra.mxu0 %v1010_v28 }
  0x16   :  { %1015 = vmatprep.subr.bf16.mxu0 %v1014_v31  ;;  %1040 = vmatprep.subr.bf16.mxu1 %v1014_v31 }
  0x18   :  { %928 = vmatmul.mubr.msk.f32.gmra.mrb[6].mxu0 %vm69_vm0, %v1218_v13  ;;  %1048 = vmatpush3.bf16.msra.mxu1 %v1014_v31 }
  0x19   :  { %930 = vmatprep.mubr.msk.f32.mxu0 %vm69_vm0, %v1223_v14  ;;  %1017 = vmatpush3.bf16.msra.mxu0 %v1014_v31 }
  0x1a   :  { %1019 = vmatprep.subr.bf16.mxu0 %v1018_v34  ;;  %1041 = vmatprep.subr.bf16.mxu1 %v1018_v34 }
  0x1c   :  { %931 = vmatmul.mubr.msk.f32.gmra.mrb[8].mxu0 %vm69_vm0, %v1232_v15  ;;  %1049 = vmatpush3.bf16.msra.mxu1 %v1018_v34 }
  0x1d   :  { %933 = vmatprep.mubr.msk.f32.mxu0 %vm69_vm0, %v1237_v16  ;;  %1021 = vmatpush3.bf16.msra.mxu0 %v1018_v34  ;;  %v1333_v34 = vand.u32 127, %v317_v33 }
  0x1e   :  { %1023 = vmatprep.subr.bf16.mxu0 %v1022_v37  ;;  %1042 = vmatprep.subr.bf16.mxu1 %v1022_v37 }
  0x1f   :  { %v323_v36 = vadd.s32 4294967288, %v1333_v34  ;;  %v337_v39 = vadd.s32 4294967272, %v1333_v34 }
  0x20   :  { %934 = vmatmul.mubr.msk.f32.gmra.mrb[10].mxu0 %vm69_vm0, %v1246_v17  ;;  %1050 = vmatpush3.bf16.msra.mxu1 %v1022_v37 }
  0x21   :  { %936 = vmatprep.mubr.msk.f32.mxu0 %vm69_vm0, %v1251_v18  ;;  %1025 = vmatpush3.bf16.msra.mxu0 %v1022_v37  ;;  %v330_v37 = vadd.s32 4294967280, %v1333_v34  ;;  %v326_v41 = vsub.s32 %v323_v36, %v1335_v35 }
  0x22   :  { %1027 = vmatprep.subr.bf16.mxu0 %v1026_v40  ;;  %1043 = vmatprep.subr.bf16.mxu1 %v1026_v40 }
  0x24   :  { %937 = vmatmul.mubr.msk.f32.gmra.mrb[12].mxu0 %vm69_vm0, %v1260_v19  ;;  %1051 = vmatpush3.bf16.msra.mxu1 %v1026_v40 }
  0x25   :  { %939 = vmatprep.mubr.msk.f32.mxu0 %vm69_vm0, %v1265_v20  ;;  %1029 = vmatpush3.bf16.msra.mxu0 %v1026_v40  ;;  %v321_v40 = vsub.s32 %v1333_v34, %v1335_v35 }
  0x26   :  { %1031 = vmatprep.subr.bf16.mxu0 %v1030_v43  ;;  %1044 = vmatprep.subr.bf16.mxu1 %v1030_v43 }
  0x28   :  { %940 = vmatmul.mubr.msk.f32.gmra.mrb[14].mxu0 %vm69_vm0, %v1274_v21  ;;  %1052 = vmatpush3.bf16.msra.mxu1 %v1030_v43 }
  0x29   :  { %1033 = vmatpush3.bf16.msra.mxu0 %v1030_v43  ;;  %1045 = vmatprep.subr.bf16.mxu1 %v1034_v0  ;;  %v333_v43 = vsub.s32 %v330_v37, %v1335_v35 }
  0x2a   :  { %1035 = vmatprep.subr.bf16.mxu0 %v1034_v0 }
  0x2c   :  { %1053 = vmatpush3.bf16.msra.mxu1 %v1034_v0 }
  0x2d   :  { %1037 = vmatpush3.bf16.msra.mxu0 %v1034_v0 }
  0xdf   :  { %v920_v45 = vpop.f32.mrb[0].mxu0 }
  0xe0   :  { %v184_v46 = vpop.f32.mrb[1].mxu0  ;;  %v270_v50 = vadd.f32 %v920_v45, %v825_v44 }
  0xe1   :  { %v269_v47 = vadd.f32 %v825_v44, %v184_v46 }
  0xe3   :  { %285 = vmin.index.xlane.f32.xlu0 %v269_v47  ;;  %v923_v48 = vpop.f32.mrb[2].mxu0  ;;  %v340_v47 = vsub.s32 %v337_v39, %v1335_v35 }
  0xe4   :  { %v194_v49 = vpop.f32.mrb[3].mxu0  ;;  %v272_v54 = vadd.f32 %v923_v48, %v825_v44  ;;  %v351_v48 = vadd.s32 4294967256, %v1333_v34 }
  0xe5   :  { %v271_v51 = vadd.f32 %v825_v44, %v194_v49  ;;  %v358_v49 = vadd.s32 4294967248, %v1333_v34 }
  0xe6   :  { %v354_v61 = vsub.s32 %v351_v48, %v1335_v35 }
  0xe7   :  { %287 = vmin.index.xlane.f32.xlu0 %v270_v50  ;;  %289 = vmin.index.xlane.f32.xlu1 %v271_v51  ;;  %v926_v52 = vpop.f32.mrb[4].mxu0  ;;  %v361_v62 = vsub.s32 %v358_v49, %v1335_v35 }
  0xe8   :  { %v204_v53 = vpop.f32.mrb[5].mxu0  ;;  %v274_v58 = vadd.f32 %v926_v52, %v825_v44 }
  0xe9   :  { %v273_v55 = vadd.f32 %v825_v44, %v204_v53 }
  0xeb   :  { %291 = vmin.index.xlane.f32.xlu1 %v272_v54  ;;  %293 = vmin.index.xlane.f32.xlu0 %v273_v55  ;;  %v929_v56 = vpop.f32.mrb[6].mxu0 }
  0xec   :  { %v214_v57 = vpop.f32.mrb[7].mxu0  ;;  %v276_v1 = vadd.f32 %v929_v56, %v825_v44 }
  0xed   :  { %v275_v59 = vadd.f32 %v825_v44, %v214_v57 }
  0xef   :  { %295 = vmin.index.xlane.f32.xlu1 %v274_v58  ;;  %297 = vmin.index.xlane.f32.xlu0 %v275_v59  ;;  %v932_v60 = vpop.f32.mrb[8].mxu0 }
  0xf0   :  { %v224_v63 = vpop.f32.mrb[9].mxu0  ;;  %v278_v6 = vadd.f32 %v932_v60, %v825_v44 }
  0xf1   :  { %v277_v2 = vadd.f32 %v825_v44, %v224_v63  ;;  %v365_v63 = vadd.s32 4294967240, %v1333_v34 }
  0xf3   :  { %299 = vmin.index.xlane.f32.xlu1 %v276_v1  ;;  %301 = vmin.index.xlane.f32.xlu0 %v277_v2  ;;  %v935_v3 = vpop.f32.mrb[10].mxu0  ;;  %v372_v2 = vadd.s32 4294967232, %v1333_v34 }
  0xf4   :  { %v234_v4 = vpop.f32.mrb[11].mxu0  ;;  %v280_v25 = vadd.f32 %v935_v3, %v825_v44 }
  0xf5   :  { %v279_v22 = vadd.f32 %v825_v44, %v234_v4  ;;  %v375_v33 = vsub.s32 %v372_v2, %v1335_v35 }
  0xf7   :  { %303 = vmin.index.xlane.f32.xlu1 %v278_v6  ;;  %305 = vmin.index.xlane.f32.xlu0 %v279_v22  ;;  %v938_v23 = vpop.f32.mrb[12].mxu0 }
  0xf8   :  { %v244_v24 = vpop.f32.mrb[13].mxu0  ;;  %v282_v30 = vadd.f32 %v938_v23, %v825_v44 }
  0xf9   :  { %v281_v26 = vadd.f32 %v825_v44, %v244_v24 }
  0xfb   :  { %307 = vmin.index.xlane.f32.xlu1 %v280_v25  ;;  %309 = vmin.index.xlane.f32.xlu0 %v281_v26  ;;  %v941_v28 = vpop.f32.mrb[14].mxu0 }
  0xfc   :  { %v254_v29 = vpop.f32.mrb[15].mxu0  ;;  %v284_v32 = vadd.f32 %v941_v28, %v825_v44  ;;  %v368_v28 = vsub.s32 %v365_v63, %v1335_v35 }
  0xfd   :  { %v283_v31 = vadd.f32 %v825_v44, %v254_v29  ;;  %v344_v44 = vadd.s32 4294967264, %v1333_v34  ;;  %v379_v29 = vadd.s32 4294967224, %v1333_v34 }
  0xff   :  { %311 = vmin.index.xlane.f32.xlu1 %v282_v30  ;;  %313 = vmin.index.xlane.f32.xlu0 %v283_v31  ;;  %v347_v55 = vsub.s32 %v344_v44, %v1335_v35  ;;  %v386_v30 = vadd.s32 4294967216, %v1333_v34 }
 0x103   :  { %315 = vmin.index.xlane.f32.xlu1 %v284_v32 }
 0x170   :  { %v286_v38 = vpop.xlane.xlu0 %285 }
 0x171   :  { %vm429_vm1 = vcmp.eq.s32.totalorder %v286_v38, %v1333_v34  ;;  %v322_v50 = vrot.slane %v286_v38, %v321_v40 }
 0x172   :  { %974 = vmatprep.mubr.msk.f32.mxu0 %vm429_vm1, %v1109_v42  ;;  %v826_v52 = vsel %vm429_vm1, 1.0, %v1108_v27 }
 0x174   :  { %v288_v45 = vpop.xlane.xlu0 %287  ;;  %v290_v46 = vpop.xlane.xlu1 %289 }
 0x175   :  { %v327_v51 = vrot.slane %v288_v45, %v326_v41  ;;  %vm430_vm3 = vcmp.eq.s32.totalorder %v288_v45, %v1333_v34  ;;  %vm431_vm4 = vcmp.eq.s32.totalorder %v290_v46, %v1333_v34  ;;  %v334_v54 = vrot.slane %v290_v46, %v333_v43 }
 0x176   :  { %v827_v53 = vsel %vm430_vm3, 1.0, %v1108_v27  ;;  %975 = vmatmul.mubr.msk.f32.vlgmr.msra.gmra.mrb[16].mxu0 %vm430_vm3, %v1109_v42  ;;  %v828_v58 = vsel %vm431_vm4, 1.0, %v1108_v27  ;;  %v382_v45 = vsub.s32 %v379_v29, %v1335_v35  ;;  %v389_v46 = vsub.s32 %v386_v30, %v1335_v35 }
 0x177   :  { %v329_v56 = vsel %vm328_vm2, %v327_v51, %v322_v50  ;;  %v662_v57 = vadd.f32 %v827_v53, %v826_v52  ;;  %977 = vmatprep.mubr.msk.f32.mxu0 %vm431_vm4, %v1109_v42  ;;  %v400_v50 = vadd.s32 4294967200, %v1333_v34  ;;  %vm377_vm2 = vcmask 589312  }
 0x178   :  { %v292_v59 = vpop.xlane.xlu1 %291  ;;  %v294_v60 = vpop.xlane.xlu0 %293  ;;  %v336_v3 = vsel %vm335_vm5, %v334_v54, %v329_v56  ;;  %vm384_vm3 = vcmask 654912   ;;  %v421_v30 = vadd.s32 4294967176, %v1333_v34 }
 0x179   :  { %v663_v0 = vadd.f32 %v828_v58, %v662_v57  ;;  %v341_v1 = vrot.slane %v292_v59, %v340_v47  ;;  %vm432_vm7 = vcmp.eq.s32.totalorder %v292_v59, %v1333_v34  ;;  %v348_v6 = vrot.slane %v294_v60, %v347_v55 }
 0x17a   :  { %v829_v4 = vsel %vm432_vm7, 1.0, %v1108_v27  ;;  %vm433_vm8 = vcmp.eq.s32.totalorder %v294_v60, %v1333_v34  ;;  %978 = vmatmul.mubr.msk.f32.gmra.mrb[18].mxu0 %vm432_vm7, %v1109_v42  ;;  %v393_v47 = vadd.s32 4294967208, %v1333_v34  ;;  %v407_v60 = vadd.s32 4294967192, %v1333_v34 }
 0x17b   :  { %v343_v22 = vsel %vm342_vm6, %v341_v1, %v336_v3  ;;  %v664_v23 = vadd.f32 %v829_v4, %v663_v0  ;;  %v830_v24 = vsel %vm433_vm8, 1.0, %v1108_v27  ;;  %980 = vmatprep.mubr.msk.f32.mxu0 %vm433_vm8, %v1109_v42  ;;  %v403_v0 = vsub.s32 %v400_v50, %v1335_v35 }
 0x17c   :  { %v296_v25 = vpop.xlane.xlu1 %295  ;;  %v298_v26 = vpop.xlane.xlu0 %297  ;;  %v350_v36 = vsel %vm349_vm9, %v348_v6, %v343_v22  ;;  %v396_v59 = vsub.s32 %v393_v47, %v1335_v35  ;;  %vm391_vm6 = vcmask 720512   ;;  %vm398_vm7 = vcmask 786112  }
 0x17d   :  { %v665_v31 = vadd.f32 %v830_v24, %v664_v23  ;;  %v355_v32 = vrot.slane %v296_v25, %v354_v61  ;;  %vm434_vm11 = vcmp.eq.s32.totalorder %v296_v25, %v1333_v34  ;;  %v362_v38 = vrot.slane %v298_v26, %v361_v62 }
 0x17e   :  { %v831_v37 = vsel %vm434_vm11, 1.0, %v1108_v27  ;;  %981 = vmatmul.mubr.msk.f32.gmra.mrb[20].mxu0 %vm434_vm11, %v1109_v42  ;;  %vm435_vm12 = vcmp.eq.s32.totalorder %v298_v26, %v1333_v34  ;;  %v414_v61 = vadd.s32 4294967184, %v1333_v34  ;;  %v410_v25 = vsub.s32 %v407_v60, %v1335_v35 }
 0x17f   :  { %v357_v39 = vsel %vm356_vm10, %v355_v32, %v350_v36  ;;  %v666_v40 = vadd.f32 %v831_v37, %v665_v31  ;;  %v832_v41 = vsel %vm435_vm12, 1.0, %v1108_v27  ;;  %983 = vmatprep.mubr.msk.f32.mxu1 %vm435_vm12, %v1109_v42  ;;  %vm405_vm10 = vcmask 851712  }
 0x180   :  { %v300_v43 = vpop.xlane.xlu1 %299  ;;  %v302_v44 = vpop.xlane.xlu0 %301  ;;  %v364_v51 = vsel %vm363_vm13, %v362_v38, %v357_v39  ;;  %v417_v26 = vsub.s32 %v414_v61, %v1335_v35  ;;  %vm412_vm11 = vcmask 917312  }
 0x181   :  { %v369_v48 = vrot.slane %v300_v43, %v368_v28  ;;  %vm436_vm15 = vcmp.eq.s32.totalorder %v300_v43, %v1333_v34  ;;  %v667_v49 = vadd.f32 %v832_v41, %v666_v40  ;;  %v376_v53 = vrot.slane %v302_v44, %v375_v33 }
 0x182   :  { %v833_v52 = vsel %vm436_vm15, 1.0, %v1108_v27  ;;  %vm437_vm1 = vcmp.eq.s32.totalorder %v302_v44, %v1333_v34  ;;  %984 = vmatmul.mubr.msk.f32.vlgmr.msra.gmra.mrb[0].mxu1 %vm436_vm15, %v1109_v42  ;;  %v424_v44 = vsub.s32 %v421_v30, %v1335_v35  ;;  %vm426_vm15 = vcmask 1048512  }
 0x183   :  { %v371_v54 = vsel %vm370_vm14, %v369_v48, %v364_v51  ;;  %v668_v55 = vadd.f32 %v833_v52, %v667_v49  ;;  %v834_v56 = vsel %vm437_vm1, 1.0, %v1108_v27  ;;  %986 = vmatprep.mubr.msk.f32.mxu1 %vm437_vm1, %v1109_v42  ;;  %vm419_vm14 = vcmask 982912  }
 0x184   :  { %v304_v57 = vpop.xlane.xlu1 %303  ;;  %v306_v58 = vpop.xlane.xlu0 %305  ;;  %v378_v1 = vsel %vm377_vm2, %v376_v53, %v371_v54  ;;  %vm659_vm2 = vcmask 253952  }
 0x185   :  { %v669_v62 = vadd.f32 %v834_v56, %v668_v55  ;;  %v383_v63 = vrot.slane %v304_v57, %v382_v45  ;;  %vm438_vm4 = vcmp.eq.s32.totalorder %v304_v57, %v1333_v34  ;;  %v390_v3 = vrot.slane %v306_v58, %v389_v46  ;;  %660 = vst.msk [vmem:[%s1526_s7] sm:$0x1] %vm659_vm2, %v1108_v27 }
 0x186   :  { %v835_v2 = vsel %vm438_vm4, 1.0, %v1108_v27  ;;  %vm439_vm5 = vcmp.eq.s32.totalorder %v306_v58, %v1333_v34  ;;  %987 = vmatmul.mubr.msk.f32.gmra.mrb[2].mxu1 %vm438_vm4, %v1109_v42 }
 0x187   :  { %v385_v4 = vsel %vm384_vm3, %v383_v63, %v378_v1  ;;  %v670_v6 = vadd.f32 %v835_v2, %v669_v62  ;;  %v836_v22 = vsel %vm439_vm5, 1.0, %v1108_v27  ;;  %989 = vmatprep.mubr.msk.f32.mxu1 %vm439_vm5, %v1109_v42  ;;  %v661_v62 = vld [vmem:[%s1525_s6] sm:$0x1] }
 0x188   :  { %v308_v23 = vpop.xlane.xlu1 %307  ;;  %v310_v24 = vpop.xlane.xlu0 %309  ;;  %v392_v31 = vsel %vm391_vm6, %v390_v3, %v385_v4 }
 0x189   :  { %v671_v28 = vadd.f32 %v836_v22, %v670_v6  ;;  %v397_v29 = vrot.slane %v308_v23, %v396_v59  ;;  %vm440_vm8 = vcmp.eq.s32.totalorder %v308_v23, %v1333_v34  ;;  %v404_v33 = vrot.slane %v310_v24, %v403_v0 }
 0x18a   :  { %v837_v32 = vsel %vm440_vm8, 1.0, %v1108_v27  ;;  %vm441_vm9 = vcmp.eq.s32.totalorder %v310_v24, %v1333_v34  ;;  %990 = vmatmul.mubr.msk.f32.gmra.mrb[4].mxu1 %vm440_vm8, %v1109_v42 }
 0x18b   :  { %v399_v36 = vsel %vm398_vm7, %v397_v29, %v392_v31  ;;  %v672_v37 = vadd.f32 %v837_v32, %v671_v28  ;;  %v838_v38 = vsel %vm441_vm9, 1.0, %v1108_v27  ;;  %992 = vmatprep.mubr.msk.f32.mxu1 %vm441_vm9, %v1109_v42 }
 0x18c   :  { %v312_v39 = vpop.xlane.xlu1 %311  ;;  %v314_v40 = vpop.xlane.xlu0 %313  ;;  %v406_v45 = vsel %vm405_vm10, %v404_v33, %v399_v36 }
 0x18d   :  { %v673_v41 = vadd.f32 %v838_v38, %v672_v37  ;;  %v411_v43 = vrot.slane %v312_v39, %v410_v25  ;;  %vm442_vm12 = vcmp.eq.s32.totalorder %v312_v39, %v1333_v34  ;;  %v418_v47 = vrot.slane %v314_v40, %v417_v26 }
 0x18e   :  { %v839_v46 = vsel %vm442_vm12, 1.0, %v1108_v27  ;;  %vm443_vm13 = vcmp.eq.s32.totalorder %v314_v40, %v1333_v34  ;;  %993 = vmatmul.mubr.msk.f32.gmra.mrb[6].mxu1 %vm442_vm12, %v1109_v42 }
 0x18f   :  { %v413_v48 = vsel %vm412_vm11, %v411_v43, %v406_v45  ;;  %v674_v49 = vadd.f32 %v839_v46, %v673_v41  ;;  %v840_v50 = vsel %vm443_vm13, 1.0, %v1108_v27  ;;  %995 = vmatprep.mubr.msk.f32.mxu1 %vm443_vm13, %v1109_v42 }
 0x190   :  { %v316_v51 = vpop.xlane.xlu1 %315  ;;  %v420_v54 = vsel %vm419_vm14, %v418_v47, %v413_v48 }
 0x191   :  { %v675_v52 = vadd.f32 %v840_v50, %v674_v49  ;;  %v425_v53 = vrot.slane %v316_v51, %v424_v44  ;;  %vm444_vm1 = vcmp.eq.s32.totalorder %v316_v51, %v1333_v34 }
 0x192   :  { %v841_v35 = vsel %vm444_vm1, 1.0, %v1108_v27  ;;  %996 = vmatmul.mubr.msk.f32.gmra.mrb[8].mxu1 %vm444_vm1, %v1109_v42 }
 0x193   :  { %v676_v55 = vadd.f32 %v841_v35, %v675_v52  ;;  %v427_v56 = vsel %vm426_vm15, %v425_v53, %v420_v54 }
 0x194   :  { %428 = vst [vmem:[#allocation4] sm:$0x1] %v427_v56 }
 0x195   :  { %v677_v57 = vrot.slane %v676_v55, 4 }
 0x197   :  { %v678_v58 = vadd.f32 %v677_v57, %v676_v55 }
 0x199   :  { %v679_v59 = vrot.slane %v678_v58, 2 }
 0x19b   :  { %v680_v60 = vadd.f32 %v679_v59, %v678_v58 }
 0x19d   :  { %v681_v61 = vrot.slane %v680_v60, 1 }
 0x19f   :  { %v682_v63 = vadd.f32 %v681_v61, %v680_v60 }
 0x1a1   :  { %v683_v0 = vadd.f32 %v682_v63, %v661_v62 }
 0x1a3   :  { %684 = vst [vmem:[%s1525_s6] sm:$0x1] %v683_v0 }
 0x1a4   :  { %1071 = shalt.err (!%p1068_p4)
}
 0x1a5   :  { %s1072_s12 = scalar_lea.hbm %s1524_s5, 16 }
 0x1a6   :  { %p1073_p5 = scmp.ne.s32.totalorder %s1524_s5, %s1072_s12  ;;  %p1076_p6 = scmp.lt.u32.totalorder %s1072_s12, %s1524_s5 }
 0x1a8   :  { %p1078_p7 = pnand %p1076_p6, %p1073_p5 }
 0x1aa   :  { %1081 = shalt.err (!%p1078_p7)
}
 0x1ab   :  { %786 = dma.vmem_to_hbm [thread:$0]  %s784_s8, 16, %s1524_s5, [#allocation5]  }
 0x1ac   :  { %s1111_s5 = smov [#allocation2]  }
 0x1ad   :  { %s767_s18 = sshll.u32 %s1111_s5, 4  ;;  %s1484_s18 = int_to_ptr.vmem [resolvable:$true] %s767_s18 }
 0x1ae   :  { %s1082_s19 = scalar_lea.vmem %s1484_s18, 2048  ;;  %p1087_p9 = scmp.lt.s32.totalorder %s1484_s18, %s1484_s18 }
 0x1af   :  { %p1083_p8 = scmp.ne.s32.totalorder %s1484_s18, %s1082_s19  ;;  %p1088_p10 = scmp.lt.s32.totalorder %s1082_s19, %s1082_s19 }
 0x1b1   :  { %p1089_p11 = por %p1088_p10, %p1087_p9 }
 0x1b3   :  { %p1090_p12 = pnand %p1089_p11, %p1083_p8 }
 0x249   :  { %v976_v27 = vpop.f32.mrb[16].mxu0 }
 0x24a   :  { %639 = vst.msk [vmem:[#allocation2 + $0x8] sm:$0xff] %vm69_vm0, %v976_v27  ;;  %v686_v34 = vsub.f32 %v976_v27, %v1176_v7  ;;  %v559_v42 = vpop.f32.mrb[17].mxu0 }
 0x24b   :  { %638 = vst.msk [vmem:[#allocation2] sm:$0xff] %vm69_vm0, %v559_v42  ;;  %v685_v1 = vsub.f32 %v559_v42, %v1169_v5 }
 0x24c   :  { %v703_v2 = vmul.f32 %v686_v34, %v686_v34 }
 0x24d   :  { %v702_v3 = vmul.f32 %v685_v1, %v685_v1  ;;  %v979_v4 = vpop.f32.mrb[18].mxu0 }
 0x24e   :  { %v719_v6 = vsel %vm69_vm0, %v703_v2, 0.0  ;;  %641 = vst.msk [vmem:[#allocation2 + $0x18] sm:$0xff] %vm69_vm0, %v979_v4  ;;  %v688_v22 = vsub.f32 %v979_v4, %v1190_v9  ;;  %v569_v23 = vpop.f32.mrb[19].mxu0 }
 0x24f   :  { %v718_v24 = vsel %vm69_vm0, %v702_v3, 0.0  ;;  %640 = vst.msk [vmem:[#allocation2 + $0x10] sm:$0xff] %vm69_vm0, %v569_v23  ;;  %v687_v7 = vsub.f32 %v569_v23, %v1181_v8 }
 0x250   :  { %v720_v25 = vadd.f32 %v719_v6, %v718_v24  ;;  %v705_v26 = vmul.f32 %v688_v22, %v688_v22 }
 0x251   :  { %v704_v28 = vmul.f32 %v687_v7, %v687_v7  ;;  %v982_v5 = vpop.f32.mrb[20].mxu0 }
 0x252   :  { %643 = vst.msk [vmem:[#allocation2 + $0x28] sm:$0xff] %vm69_vm0, %v982_v5  ;;  %v690_v29 = vsub.f32 %v982_v5, %v1204_v11  ;;  %v579_v30 = vpop.f32.mrb[21].mxu0  ;;  %v723_v33 = vsel %vm69_vm0, %v705_v26, 0.0 }
 0x253   :  { %v721_v31 = vsel %vm69_vm0, %v704_v28, 0.0  ;;  %642 = vst.msk [vmem:[#allocation2 + $0x20] sm:$0xff] %vm69_vm0, %v579_v30  ;;  %v689_v9 = vsub.f32 %v579_v30, %v1195_v10 }
 0x254   :  { %v722_v32 = vadd.f32 %v721_v31, %v720_v25  ;;  %v707_v36 = vmul.f32 %v690_v29, %v690_v29 }
 0x255   :  { %v706_v8 = vmul.f32 %v689_v9, %v689_v9  ;;  %v985_v37 = vpop.f32.mrb[0].mxu1 }
 0x256   :  { %v724_v38 = vadd.f32 %v723_v33, %v722_v32  ;;  %645 = vst.msk [vmem:[#allocation2 + $0x38] sm:$0xff] %vm69_vm0, %v985_v37  ;;  %v692_v39 = vsub.f32 %v985_v37, %v1218_v13  ;;  %v589_v40 = vpop.f32.mrb[1].mxu1  ;;  %v727_v10 = vsel %vm69_vm0, %v707_v36, 0.0 }
 0x257   :  { %v725_v11 = vsel %vm69_vm0, %v706_v8, 0.0  ;;  %644 = vst.msk [vmem:[#allocation2 + $0x30] sm:$0xff] %vm69_vm0, %v589_v40  ;;  %v691_v41 = vsub.f32 %v589_v40, %v1209_v12 }
 0x258   :  { %v726_v43 = vadd.f32 %v725_v11, %v724_v38  ;;  %v709_v44 = vmul.f32 %v692_v39, %v692_v39 }
 0x259   :  { %v708_v45 = vmul.f32 %v691_v41, %v691_v41  ;;  %v988_v46 = vpop.f32.mrb[2].mxu1 }
 0x25a   :  { %v728_v47 = vadd.f32 %v727_v10, %v726_v43  ;;  %647 = vst.msk [vmem:[#allocation2 + $0x48] sm:$0xff] %vm69_vm0, %v988_v46  ;;  %v694_v48 = vsub.f32 %v988_v46, %v1232_v15  ;;  %v599_v49 = vpop.f32.mrb[3].mxu1  ;;  %v731_v12 = vsel %vm69_vm0, %v709_v44, 0.0 }
 0x25b   :  { %v729_v13 = vsel %vm69_vm0, %v708_v45, 0.0  ;;  %646 = vst.msk [vmem:[#allocation2 + $0x40] sm:$0xff] %vm69_vm0, %v599_v49  ;;  %v693_v50 = vsub.f32 %v599_v49, %v1223_v14 }
 0x25c   :  { %v730_v51 = vadd.f32 %v729_v13, %v728_v47  ;;  %v711_v52 = vmul.f32 %v694_v48, %v694_v48 }
 0x25d   :  { %v710_v53 = vmul.f32 %v693_v50, %v693_v50  ;;  %v991_v35 = vpop.f32.mrb[4].mxu1 }
 0x25e   :  { %v732_v54 = vadd.f32 %v731_v12, %v730_v51  ;;  %649 = vst.msk [vmem:[#allocation2 + $0x58] sm:$0xff] %vm69_vm0, %v991_v35  ;;  %v696_v55 = vsub.f32 %v991_v35, %v1246_v17  ;;  %v609_v56 = vpop.f32.mrb[5].mxu1  ;;  %v735_v14 = vsel %vm69_vm0, %v711_v52, 0.0 }
 0x25f   :  { %v733_v15 = vsel %vm69_vm0, %v710_v53, 0.0  ;;  %648 = vst.msk [vmem:[#allocation2 + $0x50] sm:$0xff] %vm69_vm0, %v609_v56  ;;  %v695_v57 = vsub.f32 %v609_v56, %v1237_v16 }
 0x260   :  { %v734_v58 = vadd.f32 %v733_v15, %v732_v54  ;;  %v713_v59 = vmul.f32 %v696_v55, %v696_v55 }
 0x261   :  { %v712_v60 = vmul.f32 %v695_v57, %v695_v57  ;;  %v994_v61 = vpop.f32.mrb[6].mxu1 }
 0x262   :  { %v736_v62 = vadd.f32 %v735_v14, %v734_v58  ;;  %651 = vst.msk [vmem:[#allocation2 + $0x68] sm:$0xff] %vm69_vm0, %v994_v61  ;;  %v698_v17 = vsub.f32 %v994_v61, %v1260_v19  ;;  %v619_v63 = vpop.f32.mrb[7].mxu1  ;;  %v739_v34 = vsel %vm69_vm0, %v713_v59, 0.0 }
 0x263   :  { %v737_v0 = vsel %vm69_vm0, %v712_v60, 0.0  ;;  %650 = vst.msk [vmem:[#allocation2 + $0x60] sm:$0xff] %vm69_vm0, %v619_v63  ;;  %v697_v16 = vsub.f32 %v619_v63, %v1251_v18 }
 0x264   :  { %v738_v27 = vadd.f32 %v737_v0, %v736_v62  ;;  %v715_v42 = vmul.f32 %v698_v17, %v698_v17 }
 0x265   :  { %v714_v1 = vmul.f32 %v697_v16, %v697_v16  ;;  %v997_v2 = vpop.f32.mrb[8].mxu1 }
 0x266   :  { %v740_v3 = vadd.f32 %v739_v34, %v738_v27  ;;  %653 = vst.msk [vmem:[#allocation2 + $0x78] sm:$0xff] %vm69_vm0, %v997_v2  ;;  %v700_v19 = vsub.f32 %v997_v2, %v1274_v21  ;;  %v629_v4 = vpop.f32.mrb[9].mxu1 }
 0x267   :  { %v741_v6 = vsel %vm69_vm0, %v714_v1, 0.0  ;;  %652 = vst.msk [vmem:[#allocation2 + $0x70] sm:$0xff] %vm69_vm0, %v629_v4  ;;  %v699_v18 = vsub.f32 %v629_v4, %v1265_v20 }
 0x268   :  { %v742_v22 = vadd.f32 %v741_v6, %v740_v3 }
 0x269   :  { %1093 = shalt.err (!%p1090_p12)
}
 0x26a   :  { %s1094_s22 = scalar_lea.hbm %s1523_s4, 2048 }
 0x26b   :  { %p1095_p13 = scmp.ne.s32.totalorder %s1523_s4, %s1094_s22  ;;  %p1098_p0 = scmp.lt.u32.totalorder %s1094_s22, %s1523_s4 }
 0x26d   :  { %p1100_p1 = pnand %p1098_p0, %p1095_p13 }
 0x26f   :  { %1103 = shalt.err (!%p1100_p1)
}
 0x270   :  { %s1112_s3 = smov 128   ;;  %s1113_s25 = smov 8   ;;  %v743_v20 = vsel %vm69_vm0, %v715_v42, 0.0  ;;  %v717_v21 = vmul.f32 %v700_v19, %v700_v19  ;;  %v716_v23 = vmul.f32 %v699_v18, %v699_v18  ;;  %v701_v32 = vld [vmem:[%s1526_s7] sm:$0x1] }
 0x271   :  { %773 = dma.vmem_to_hbm [thread:$0]  %s1484_s18, 2048, %s1523_s4, [#allocation3], %s1112_s3, %s1112_s3, %s1113_s25   ;;  %v744_v24 = vadd.f32 %v743_v20, %v742_v22 }
 0x272   :  { %v745_v7 = vsel %vm69_vm0, %v716_v23, 0.0  ;;  %v747_v26 = vsel %vm69_vm0, %v717_v21, 0.0 }
 0x273   :  { %v746_v25 = vadd.f32 %v745_v7, %v744_v24 }
 0x275   :  { %v748_v28 = vadd.f32 %v747_v26, %v746_v25 }
 0x277   :  { %v749_v5 = vrot.slane %v748_v28, 4 }
 0x279   :  { %v750_v29 = vadd.f32 %v749_v5, %v748_v28 }
 0x27b   :  { %v751_v30 = vrot.slane %v750_v29, 2 }
 0x27d   :  { %v752_v31 = vadd.f32 %v751_v30, %v750_v29 }
 0x27f   :  { %v753_v9 = vrot.slane %v752_v31, 1 }
 0x281   :  { %v754_v33 = vadd.f32 %v753_v9, %v752_v31 }
 0x283   :  { %v755_v36 = vadd.f32 %v754_v33, %v701_v32 }
 0x285   :  { %757 = vst.msk [vmem:[%s1526_s7] sm:$0x1] %vm659_vm2, %v755_v36 }
 0x286   :  { %1104 = dma.done.wait [#allocation3], 2048  }
 0x287   :  { %1105 = vsyncadd [#allocation3], 4294965248 }
 0x288   :  { %1106 = dma.done.wait [#allocation5], 16  }
 0x289   :  { %1107 = vsyncadd [#allocation5], 4294967280 }
 0x28a   :  { %801 = vsyncpa [#allocation3], 1 }
 0x28b   :  { %802 = vsyncpa [#allocation5], 1 }

</bundles_post_ra>
